<compile_context>
chip_gen: v5e
topology: v5e:2x2
jax: 0.10.0
libtpu: 0.0.40
codegen_flags: <defaults>
</compile_context>

<pallas_src>
import functools
import math

import jax
import jax.numpy as jnp
from jax import lax
from jax.experimental import pallas as pl
from jax.experimental.pallas import tpu as pltpu


def _round_up(x, m):
    return (x + m - 1) // m * m


def _sigmoid(x):
    # sigmoid(x) == 0.5 * tanh(0.5 * x) + 0.5 : one EUP op (tanh) + VPU mul/add,
    # avoiding an exp + divide pair on the single EUP port.
    return 0.5 * jnp.tanh(0.5 * x) + 0.5


def _lstm_recurrence_kernel(preact_ref, whh_ref, h0_ref, c0_ref,
                            hs_ref, hn_ref, cn_ref,
                            h_sc, c_sc,
                            *, hp, b, u, t_blk, seq_len, outer_unroll):
    """Runs `t_blk` LSTM timesteps per grid step.

    preact_ref: (t_blk*b, 4*hp) bf16  x@W_ih^T + (b_ih+b_hh); row = t*b + batch
    whh_ref:    (hp, 4*hp)      f32   W_hh^T laid out with gate pitch hp
    h0/c0_ref:  (b, hp)         f32   initial state
    hs_ref:     (t_blk*b, hp)   bf16  per-timestep hidden states (dense rows)
    hn/cn_ref:  (b, hp)         f32   final state (written on the last block)
    h_sc/c_sc:  (b, hp)         f32   recurrent carry across grid steps
    """
    blk = pl.program_id(0)
    n_blk = pl.num_programs(0)
    rows = u * b                       # 16-sublane-aligned row chunk (u timesteps)
    n_chunks = t_blk // u

    @pl.when(blk == 0)
    def _():
        h_sc[...] = h0_ref[...]
        c_sc[...] = c0_ref[...]

    def run_block(freeze_tail):
        def chunk_step(ci, carry):
            h_prev, c_prev = carry
            r0 = pl.multiple_of(ci * rows, rows)
            # Aligned dynamic load of u timesteps of pre-activations (bf16 -> f32).
            pre_chunk = preact_ref[pl.ds(r0, rows), :].astype(jnp.float32)
            h_outs = []
            for uu in range(u):        # serially dependent -> static inner unroll
                pre_t = pre_chunk[uu * b:(uu + 1) * b, :]
                # TODO(synk): pin W_hh^T in the MXU weight registers via
                # pltpu.matmul_push_rhs / matmul_acc_lhs / matmul_pop so the RHS is
                # not re-streamed through the MXU every timestep on the serial path.
                gates = pre_t + jnp.dot(h_prev, whh_ref[...],
                                        preferred_element_type=jnp.float32)
                i_g = _sigmoid(gates[:, 0 * hp:1 * hp])
                f_g = _sigmoid(gates[:, 1 * hp:2 * hp])
                g_g = jnp.tanh(gates[:, 2 * hp:3 * hp])
                o_g = _sigmoid(gates[:, 3 * hp:4 * hp])
                c_new = f_g * c_prev + i_g * g_g
                h_new = o_g * jnp.tanh(c_new)
                if freeze_tail:
                    # Only compiled for the final partial block: freeze the carry
                    # on padded trailing timesteps so (h_n, c_n) stay correct.
                    valid = (blk * t_blk + ci * u + uu) < seq_len
                    h_new = jnp.where(valid, h_new, h_prev)
                    c_new = jnp.where(valid, c_new, c_prev)
                h_outs.append(h_new)
                h_prev, c_prev = h_new, c_new
            # One aligned, dense store of u timesteps of hidden states.
            hs_ref[pl.ds(r0, rows), :] = jnp.concatenate(
                h_outs, axis=0).astype(hs_ref.dtype)
            return (h_prev, c_prev)

        h_fin, c_fin = lax.fori_loop(0, n_chunks, chunk_step,
                                     (h_sc[...], c_sc[...]),
                                     unroll=outer_unroll)
        h_sc[...] = h_fin
        c_sc[...] = c_fin

    if seq_len % t_blk == 0:
        run_block(False)                      # no padded timesteps anywhere
    else:
        @pl.when(blk < n_blk - 1)
        def _():
            run_block(False)                  # full blocks: no masking at all

        @pl.when(blk == n_blk - 1)
        def _():
            run_block(True)                   # only the final partial block masks

    @pl.when(blk == n_blk - 1)
    def _():
        hn_ref[...] = h_sc[...].astype(hn_ref.dtype)
        cn_ref[...] = c_sc[...].astype(cn_ref.dtype)


def rnnet_forward(sequence, states, params, *, t_blk=None):
    """Forward of RNnet.

    sequence: int32 (batch, seq_len) token ids
    states:   (h0, c0), each (num_layers=1, batch, hidden)
    params:   dict with embedding / LSTM / Linear weights (PyTorch shapes)
    Returns (output, (h_n, c_n)) with output of shape (seq_len*batch, output_size).
    """
    emb_w = params["embedding"].astype(jnp.float32)    # (vocab, I)
    w_ih = params["w_ih"].astype(jnp.float32)          # (4H, I)
    w_hh = params["w_hh"].astype(jnp.float32)          # (4H, H)
    b_ih = params["b_ih"].astype(jnp.float32)          # (4H,)
    b_hh = params["b_hh"].astype(jnp.float32)          # (4H,)
    w_out = params["w_out"].astype(jnp.float32)        # (O, H)
    b_out = params["b_out"].astype(jnp.float32)        # (O,)

    h0, c0 = states
    h0 = h0[0].astype(jnp.float32)                     # (B, H), num_layers == 1
    c0 = c0[0].astype(jnp.float32)

    B, S = sequence.shape
    I = emb_w.shape[1]
    H = w_hh.shape[1]
    O = w_out.shape[0]

    # Gate pitch HP: pad each gate to 128 lanes only when H is already close to a
    # lane multiple; for small H keep the 4 gates contiguous (4*H lanes total).
    hp_pad = _round_up(H, 128)
    if H % 128 == 0:
        HP = H
    elif 2 * hp_pad <= 3 * H:            # padding overhead <= 50%
        HP = hp_pad
    else:
        HP = H                           # e.g. H=32: contiguous 4H=128 gate lanes

    # Row-chunk geometry: bf16 streams want 16-row (packed sublane) aligned blocks.
    ALIGN = 16
    U = ALIGN // math.gcd(B, ALIGN)      # timesteps per aligned row chunk
    if t_blk is None:
        t_blk = 128                      # timesteps per grid step (sweep 64-512)
    t_blk = _round_up(max(1, min(t_blk, S)), U)
    n_chunks = t_blk // U
    outer_unroll = max(1, math.gcd(n_chunks, max(1, 8 // min(U, 8))))
    num_blocks = pl.cdiv(S, t_blk)
    S_pad = num_blocks * t_blk

    # ---- Glue (off the serial path): embedding gather + hoisted projections ----
    embeds = jnp.take(emb_w, sequence, axis=0)                 # (B, S, I)
    x = jnp.transpose(embeds, (1, 0, 2)).reshape(S * B, I)     # row = t*B + b

    # Gate-packed weights: gate k occupies lanes [k*HP, k*HP + H); pad lanes are 0
    # so the h/c pad lanes stay exactly 0 through the recurrence.
    w_ih_p = jnp.zeros((I, 4, HP), jnp.float32)
    w_ih_p = w_ih_p.at[:, :, :H].set(jnp.transpose(w_ih).reshape(I, 4, H))
    w_ih_p = w_ih_p.reshape(I, 4 * HP)

    bias_p = jnp.zeros((4, HP), jnp.float32)
    bias_p = bias_p.at[:, :H].set((b_ih + b_hh).reshape(4, H)).reshape(4 * HP)

    w_hh_p = jnp.zeros((HP, 4, HP), jnp.float32)
    w_hh_p = w_hh_p.at[:H, :, :H].set(jnp.transpose(w_hh).reshape(H, 4, H))
    w_hh_p = w_hh_p.reshape(HP, 4 * HP)

    # One batched bf16 matmul for all timesteps; stream the result as bf16.
    preact = jnp.dot(x.astype(jnp.bfloat16), w_ih_p.astype(jnp.bfloat16),
                     preferred_element_type=jnp.float32) + bias_p
    preact = preact.astype(jnp.bfloat16)                       # (S*B, 4*HP)
    if S_pad > S:
        preact = jnp.pad(preact, ((0, (S_pad - S) * B), (0, 0)))

    h0_p = jnp.zeros((B, HP), jnp.float32).at[:, :H].set(h0)
    c0_p = jnp.zeros((B, HP), jnp.float32).at[:, :H].set(c0)

    kernel = functools.partial(
        _lstm_recurrence_kernel, hp=HP, b=B, u=U, t_blk=t_blk, seq_len=S,
        outer_unroll=outer_unroll)

    # VMEM budget: double-buffered bf16 preact/hs blocks + f32 W_hh + states/carry.
    vmem_bytes = (2 * t_blk * B * 4 * HP * 2      # preact blocks (bf16, x2 buffers)
                  + 2 * t_blk * B * HP * 2        # hs blocks   (bf16, x2 buffers)
                  + 2 * HP * 4 * HP * 4           # W_hh^T      (f32,  x2 buffers)
                  + 16 * B * HP * 4               # h0/c0/hn/cn/carries + slack
                  + (2 << 20))                    # margin / internal scratch
    vmem_limit = int(min(max(vmem_bytes, 16 << 20), 110 << 20))

    grid_spec = pltpu.PrefetchScalarGridSpec(
        num_scalar_prefetch=0,
        grid=(num_blocks,),
        in_specs=[
            pl.BlockSpec((t_blk * B, 4 * HP), lambda i: (i, 0)),   # preact rows
            pl.BlockSpec((HP, 4 * HP), lambda i: (0, 0)),          # W_hh^T
            pl.BlockSpec((B, HP), lambda i: (0, 0)),               # h0
            pl.BlockSpec((B, HP), lambda i: (0, 0)),               # c0
        ],
        out_specs=[
            pl.BlockSpec((t_blk * B, HP), lambda i: (i, 0)),       # hs rows
            pl.BlockSpec((B, HP), lambda i: (0, 0)),               # h_n
            pl.BlockSpec((B, HP), lambda i: (0, 0)),               # c_n
        ],
        scratch_shapes=[
            pltpu.VMEM((B, HP), jnp.float32),                      # h carry
            pltpu.VMEM((B, HP), jnp.float32),                      # c carry
        ],
    )

    # TODO(synk): on v7x, add a leading "parallel" batch grid axis so each of the
    # two TensorCores runs an independent recurrence over its own batch slice.
    hs, h_n, c_n = pl.pallas_call(
        kernel,
        grid_spec=grid_spec,
        out_shape=(
            jax.ShapeDtypeStruct((S_pad * B, HP), jnp.bfloat16),
            jax.ShapeDtypeStruct((B, HP), jnp.float32),
            jax.ShapeDtypeStruct((B, HP), jnp.float32),
        ),
        compiler_params=pltpu.CompilerParams(
            dimension_semantics=("arbitrary",),       # time recurrence is serial
            vmem_limit_bytes=vmem_limit,
        ),
    )(preact, w_hh_p, h0_p, c0_p)

    # ---- Deferred hidden2out Linear: one (S*B, H) @ (H, O) bf16 matmul ----------
    hs = hs[:S * B, :H]                                             # (S*B, H) bf16
    output = jnp.dot(hs, jnp.transpose(w_out).astype(jnp.bfloat16),
                     preferred_element_type=jnp.float32) + b_out    # (S*B, O) f32
    return output, (h_n[None, :, :H], c_n[None, :, :H])


def rnnet_forward_ref(sequence, states, params):
    """Pure-JAX f32 reference (mirrors torch semantics) for verification."""
    emb_w = params["embedding"]
    w_ih, w_hh = params["w_ih"], params["w_hh"]
    b_ih, b_hh = params["b_ih"], params["b_hh"]
    w_out, b_out = params["w_out"], params["b_out"]
    h0, c0 = states[0][0], states[1][0]
    H = w_hh.shape[1]

    embeds = jnp.transpose(jnp.take(emb_w, sequence, axis=0), (1, 0, 2))  # (S,B,I)

    def step(carry, x_t):
        h, c = carry
        gates = x_t @ w_ih.T + b_ih + h @ w_hh.T + b_hh
        i = jax.nn.sigmoid(gates[:, 0 * H:1 * H])
        f = jax.nn.sigmoid(gates[:, 1 * H:2 * H])
        g = jnp.tanh(gates[:, 2 * H:3 * H])
        o = jax.nn.sigmoid(gates[:, 3 * H:4 * H])
        c_new = f * c + i * g
        h_new = o * jnp.tanh(c_new)
        return (h_new, c_new), h_new

    (h_n, c_n), hs = jax.lax.scan(step, (h0, c0), embeds)
    out = hs @ w_out.T + b_out
    return out.reshape(-1, w_out.shape[0]), (h_n[None], c_n[None])


if __name__ == "__main__":
    # Small, deterministic setup consistent with the module's __init__.
    vocab_size = 20
    input_size = 16      # embedding dim == LSTM input_size
    hidden_size = 32
    output_size = 10
    batch = 2
    seq_len = 8
    num_layers = 1

    key = jax.random.PRNGKey(0)
    ks = jax.random.split(key, 8)
    params = {
        "embedding": jax.random.normal(ks[0], (vocab_size, input_size), jnp.float32) * 0.5,
        "w_ih": jax.random.normal(ks[1], (4 * hidden_size, input_size), jnp.float32) * 0.1,
        "w_hh": jax.random.normal(ks[2], (4 * hidden_size, hidden_size), jnp.float32) * 0.1,
        "b_ih": jax.random.normal(ks[3], (4 * hidden_size,), jnp.float32) * 0.1,
        "b_hh": jax.random.normal(ks[4], (4 * hidden_size,), jnp.float32) * 0.1,
        "w_out": jax.random.normal(ks[5], (output_size, hidden_size), jnp.float32) * 0.1,
        "b_out": jax.random.normal(ks[6], (output_size,), jnp.float32) * 0.1,
    }

    sequence = jax.random.randint(ks[7], (batch, seq_len), 0, vocab_size, jnp.int32)
    h0 = jnp.zeros((num_layers, batch, hidden_size), jnp.float32)
    c0 = jnp.zeros((num_layers, batch, hidden_size), jnp.float32)

    out, (h_n, c_n) = rnnet_forward(sequence, (h0, c0), params)
    jax.block_until_ready((out, h_n, c_n))

    # Verify against the pure-JAX f32 reference (preact/hs are streamed in bf16,
    # hence the looser tolerance).
    out_ref, (h_ref, c_ref) = rnnet_forward_ref(sequence, (h0, c0), params)
    assert out.shape == (seq_len * batch, output_size)
    assert jnp.allclose(out, out_ref, atol=2e-2, rtol=2e-2)
    assert jnp.allclose(h_n, h_ref, atol=2e-2, rtol=2e-2)
    assert jnp.allclose(c_n, c_ref, atol=2e-2, rtol=2e-2)

    print("KERNEL_OK")
</pallas_src>

<mosaic_0001>
module attributes {stable_mosaic.version = 11 : i64} {
  func.func @_lstm_recurrence_kernel(%arg0: i32, %arg1: memref<16x128xbf16, #tpu.memory_space<vmem>>, %arg2: memref<32x128xf32, #tpu.memory_space<vmem>>, %arg3: memref<2x32xf32, #tpu.memory_space<vmem>>, %arg4: memref<2x32xf32, #tpu.memory_space<vmem>>, %arg5: memref<16x32xbf16, #tpu.memory_space<vmem>>, %arg6: memref<2x32xf32, #tpu.memory_space<vmem>>, %arg7: memref<2x32xf32, #tpu.memory_space<vmem>>, %arg8: memref<2x32xf32, #tpu.memory_space<vmem>>, %arg9: memref<2x32xf32, #tpu.memory_space<vmem>>) attributes {dimension_semantics = [#tpu.dimension_semantics<arbitrary>], iteration_bounds = array<i64: 1>, scalar_prefetch = 0 : i64, scratch_operands = 2 : i64, tpu.core_type = #tpu.core_type<tc>, window_params = [{transform_indices = @transform_0, window_bounds = array<i64: 16, 128>}, {pipeline_mode = #tpu.pipeline_mode<synchronous>, transform_indices = @transform_1, window_bounds = array<i64: 32, 128>}, {pipeline_mode = #tpu.pipeline_mode<synchronous>, transform_indices = @transform_2, window_bounds = array<i64: 2, 32>}, {pipeline_mode = #tpu.pipeline_mode<synchronous>, transform_indices = @transform_3, window_bounds = array<i64: 2, 32>}, {transform_indices = @transform_4, window_bounds = array<i64: 16, 32>}, {pipeline_mode = #tpu.pipeline_mode<synchronous>, transform_indices = @transform_5, window_bounds = array<i64: 2, 32>}, {pipeline_mode = #tpu.pipeline_mode<synchronous>, transform_indices = @transform_6, window_bounds = array<i64: 2, 32>}]} {
    %c0_i32 = arith.constant 0 : i32
    %0 = arith.cmpi eq, %arg0, %c0_i32 : i32
    %1 = arith.extui %0 : i1 to i32
    %c0_i32_0 = arith.constant 0 : i32
    %2 = arith.cmpi ne, %1, %c0_i32_0 : i32
    scf.if %2 {
      %c0_108 = arith.constant 0 : index
      %c0_109 = arith.constant 0 : index
      %299 = vector.load %arg3[%c0_108, %c0_109] : memref<2x32xf32, #tpu.memory_space<vmem>>, vector<2x32xf32>
      %c0_110 = arith.constant 0 : index
      %c0_111 = arith.constant 0 : index
      %300 = vector.load %arg8[%c0_110, %c0_111] : memref<2x32xf32, #tpu.memory_space<vmem>>, vector<2x32xf32>
      tpu.vector_store %arg8[%c0_110, %c0_111], %299 {strides = array<i32>} : memref<2x32xf32, #tpu.memory_space<vmem>>, vector<2x32xf32>,
      %c0_112 = arith.constant 0 : index
      %c0_113 = arith.constant 0 : index
      %301 = vector.load %arg4[%c0_112, %c0_113] : memref<2x32xf32, #tpu.memory_space<vmem>>, vector<2x32xf32>
      %c0_114 = arith.constant 0 : index
      %c0_115 = arith.constant 0 : index
      %302 = vector.load %arg9[%c0_114, %c0_115] : memref<2x32xf32, #tpu.memory_space<vmem>>, vector<2x32xf32>
      tpu.vector_store %arg9[%c0_114, %c0_115], %301 {strides = array<i32>} : memref<2x32xf32, #tpu.memory_space<vmem>>, vector<2x32xf32>,
    } else {
    }
    %c0 = arith.constant 0 : index
    %c0_1 = arith.constant 0 : index
    %3 = vector.load %arg8[%c0, %c0_1] : memref<2x32xf32, #tpu.memory_space<vmem>>, vector<2x32xf32>
    %c0_2 = arith.constant 0 : index
    %c0_3 = arith.constant 0 : index
    %4 = vector.load %arg9[%c0_2, %c0_3] : memref<2x32xf32, #tpu.memory_space<vmem>>, vector<2x32xf32>
    %c0_i32_4 = arith.constant 0 : i32
    %c16_i32 = arith.constant 16 : i32
    %5 = arith.muli %c0_i32_4, %c16_i32 : i32
    %6 = tpu.assume_multiple %5, 16 : i32
    %7 = arith.index_cast %6 : i32 to index
    %c0_5 = arith.constant 0 : index
    %8 = vector.load %arg1[%7, %c0_5] : memref<16x128xbf16, #tpu.memory_space<vmem>>, vector<16x128xbf16>
    %9 = arith.extf %8 : vector<16x128xbf16> to vector<16x128xf32>
    %10 = vector.extract_strided_slice %9 {offsets = [0, 0], sizes = [2, 128], strides = [1, 1]} : vector<16x128xf32> to vector<2x128xf32>
    %c0_6 = arith.constant 0 : index
    %c0_7 = arith.constant 0 : index
    %11 = vector.load %arg2[%c0_6, %c0_7] : memref<32x128xf32, #tpu.memory_space<vmem>>, vector<32x128xf32>
    %cst = arith.constant dense<0.000000e+00> : vector<2x128xf32>
    %12 = tpu.matmul %3, %11, %cst {dimension_numbers = #tpu.dot_dimension_numbers<[1], [0], [0], [1], [0, 0, 1, 1], [], []>} : vector<2x32xf32>, vector<32x128xf32>, vector<2x128xf32> -> vector<2x128xf32>
    %13 = arith.addf %10, %12 : vector<2x128xf32>
    %14 = vector.extract_strided_slice %13 {offsets = [0, 0], sizes = [2, 32], strides = [1, 1]} : vector<2x128xf32> to vector<2x32xf32>
    %cst_8 = arith.constant 5.000000e-01 : f32
    %15 = vector.broadcast %cst_8 : f32 to vector<2x32xf32>
    %16 = arith.mulf %15, %14 : vector<2x32xf32>
    %17 = math.tanh %16 : vector<2x32xf32>
    %cst_9 = arith.constant 5.000000e-01 : f32
    %18 = vector.broadcast %cst_9 : f32 to vector<2x32xf32>
    %19 = arith.mulf %18, %17 : vector<2x32xf32>
    %cst_10 = arith.constant 5.000000e-01 : f32
    %20 = vector.broadcast %cst_10 : f32 to vector<2x32xf32>
    %21 = arith.addf %19, %20 : vector<2x32xf32>
    %22 = vector.extract_strided_slice %13 {offsets = [0, 32], sizes = [2, 32], strides = [1, 1]} : vector<2x128xf32> to vector<2x32xf32>
    %cst_11 = arith.constant 5.000000e-01 : f32
    %23 = vector.broadcast %cst_11 : f32 to vector<2x32xf32>
    %24 = arith.mulf %23, %22 : vector<2x32xf32>
    %25 = math.tanh %24 : vector<2x32xf32>
    %cst_12 = arith.constant 5.000000e-01 : f32
    %26 = vector.broadcast %cst_12 : f32 to vector<2x32xf32>
    %27 = arith.mulf %26, %25 : vector<2x32xf32>
    %cst_13 = arith.constant 5.000000e-01 : f32
    %28 = vector.broadcast %cst_13 : f32 to vector<2x32xf32>
    %29 = arith.addf %27, %28 : vector<2x32xf32>
    %30 = vector.extract_strided_slice %13 {offsets = [0, 64], sizes = [2, 32], strides = [1, 1]} : vector<2x128xf32> to vector<2x32xf32>
    %31 = math.tanh %30 : vector<2x32xf32>
    %32 = vector.extract_strided_slice %13 {offsets = [0, 96], sizes = [2, 32], strides = [1, 1]} : vector<2x128xf32> to vector<2x32xf32>
    %cst_14 = arith.constant 5.000000e-01 : f32
    %33 = vector.broadcast %cst_14 : f32 to vector<2x32xf32>
    %34 = arith.mulf %33, %32 : vector<2x32xf32>
    %35 = math.tanh %34 : vector<2x32xf32>
    %cst_15 = arith.constant 5.000000e-01 : f32
    %36 = vector.broadcast %cst_15 : f32 to vector<2x32xf32>
    %37 = arith.mulf %36, %35 : vector<2x32xf32>
    %cst_16 = arith.constant 5.000000e-01 : f32
    %38 = vector.broadcast %cst_16 : f32 to vector<2x32xf32>
    %39 = arith.addf %37, %38 : vector<2x32xf32>
    %40 = arith.mulf %29, %4 : vector<2x32xf32>
    %41 = arith.mulf %21, %31 : vector<2x32xf32>
    %42 = arith.addf %40, %41 : vector<2x32xf32>
    %43 = math.tanh %42 : vector<2x32xf32>
    %44 = arith.mulf %39, %43 : vector<2x32xf32>
    %45 = vector.extract_strided_slice %9 {offsets = [2, 0], sizes = [2, 128], strides = [1, 1]} : vector<16x128xf32> to vector<2x128xf32>
    %c0_17 = arith.constant 0 : index
    %c0_18 = arith.constant 0 : index
    %46 = vector.load %arg2[%c0_17, %c0_18] : memref<32x128xf32, #tpu.memory_space<vmem>>, vector<32x128xf32>
    %cst_19 = arith.constant dense<0.000000e+00> : vector<2x128xf32>
    %47 = tpu.matmul %44, %46, %cst_19 {dimension_numbers = #tpu.dot_dimension_numbers<[1], [0], [0], [1], [0, 0, 1, 1], [], []>} : vector<2x32xf32>, vector<32x128xf32>, vector<2x128xf32> -> vector<2x128xf32>
    %48 = arith.addf %45, %47 : vector<2x128xf32>
    %49 = vector.extract_strided_slice %48 {offsets = [0, 0], sizes = [2, 32], strides = [1, 1]} : vector<2x128xf32> to vector<2x32xf32>
    %cst_20 = arith.constant 5.000000e-01 : f32
    %50 = vector.broadcast %cst_20 : f32 to vector<2x32xf32>
    %51 = arith.mulf %50, %49 : vector<2x32xf32>
    %52 = math.tanh %51 : vector<2x32xf32>
    %cst_21 = arith.constant 5.000000e-01 : f32
    %53 = vector.broadcast %cst_21 : f32 to vector<2x32xf32>
    %54 = arith.mulf %53, %52 : vector<2x32xf32>
    %cst_22 = arith.constant 5.000000e-01 : f32
    %55 = vector.broadcast %cst_22 : f32 to vector<2x32xf32>
    %56 = arith.addf %54, %55 : vector<2x32xf32>
    %57 = vector.extract_strided_slice %48 {offsets = [0, 32], sizes = [2, 32], strides = [1, 1]} : vector<2x128xf32> to vector<2x32xf32>
    %cst_23 = arith.constant 5.000000e-01 : f32
    %58 = vector.broadcast %cst_23 : f32 to vector<2x32xf32>
    %59 = arith.mulf %58, %57 : vector<2x32xf32>
    %60 = math.tanh %59 : vector<2x32xf32>
    %cst_24 = arith.constant 5.000000e-01 : f32
    %61 = vector.broadcast %cst_24 : f32 to vector<2x32xf32>
    %62 = arith.mulf %61, %60 : vector<2x32xf32>
    %cst_25 = arith.constant 5.000000e-01 : f32
    %63 = vector.broadcast %cst_25 : f32 to vector<2x32xf32>
    %64 = arith.addf %62, %63 : vector<2x32xf32>
    %65 = vector.extract_strided_slice %48 {offsets = [0, 64], sizes = [2, 32], strides = [1, 1]} : vector<2x128xf32> to vector<2x32xf32>
    %66 = math.tanh %65 : vector<2x32xf32>
    %67 = vector.extract_strided_slice %48 {offsets = [0, 96], sizes = [2, 32], strides = [1, 1]} : vector<2x128xf32> to vector<2x32xf32>
    %cst_26 = arith.constant 5.000000e-01 : f32
    %68 = vector.broadcast %cst_26 : f32 to vector<2x32xf32>
    %69 = arith.mulf %68, %67 : vector<2x32xf32>
    %70 = math.tanh %69 : vector<2x32xf32>
    %cst_27 = arith.constant 5.000000e-01 : f32
    %71 = vector.broadcast %cst_27 : f32 to vector<2x32xf32>
    %72 = arith.mulf %71, %70 : vector<2x32xf32>
    %cst_28 = arith.constant 5.000000e-01 : f32
    %73 = vector.broadcast %cst_28 : f32 to vector<2x32xf32>
    %74 = arith.addf %72, %73 : vector<2x32xf32>
    %75 = arith.mulf %64, %42 : vector<2x32xf32>
    %76 = arith.mulf %56, %66 : vector<2x32xf32>
    %77 = arith.addf %75, %76 : vector<2x32xf32>
    %78 = math.tanh %77 : vector<2x32xf32>
    %79 = arith.mulf %74, %78 : vector<2x32xf32>
    %80 = vector.extract_strided_slice %9 {offsets = [4, 0], sizes = [2, 128], strides = [1, 1]} : vector<16x128xf32> to vector<2x128xf32>
    %c0_29 = arith.constant 0 : index
    %c0_30 = arith.constant 0 : index
    %81 = vector.load %arg2[%c0_29, %c0_30] : memref<32x128xf32, #tpu.memory_space<vmem>>, vector<32x128xf32>
    %cst_31 = arith.constant dense<0.000000e+00> : vector<2x128xf32>
    %82 = tpu.matmul %79, %81, %cst_31 {dimension_numbers = #tpu.dot_dimension_numbers<[1], [0], [0], [1], [0, 0, 1, 1], [], []>} : vector<2x32xf32>, vector<32x128xf32>, vector<2x128xf32> -> vector<2x128xf32>
    %83 = arith.addf %80, %82 : vector<2x128xf32>
    %84 = vector.extract_strided_slice %83 {offsets = [0, 0], sizes = [2, 32], strides = [1, 1]} : vector<2x128xf32> to vector<2x32xf32>
    %cst_32 = arith.constant 5.000000e-01 : f32
    %85 = vector.broadcast %cst_32 : f32 to vector<2x32xf32>
    %86 = arith.mulf %85, %84 : vector<2x32xf32>
    %87 = math.tanh %86 : vector<2x32xf32>
    %cst_33 = arith.constant 5.000000e-01 : f32
    %88 = vector.broadcast %cst_33 : f32 to vector<2x32xf32>
    %89 = arith.mulf %88, %87 : vector<2x32xf32>
    %cst_34 = arith.constant 5.000000e-01 : f32
    %90 = vector.broadcast %cst_34 : f32 to vector<2x32xf32>
    %91 = arith.addf %89, %90 : vector<2x32xf32>
    %92 = vector.extract_strided_slice %83 {offsets = [0, 32], sizes = [2, 32], strides = [1, 1]} : vector<2x128xf32> to vector<2x32xf32>
    %cst_35 = arith.constant 5.000000e-01 : f32
    %93 = vector.broadcast %cst_35 : f32 to vector<2x32xf32>
    %94 = arith.mulf %93, %92 : vector<2x32xf32>
    %95 = math.tanh %94 : vector<2x32xf32>
    %cst_36 = arith.constant 5.000000e-01 : f32
    %96 = vector.broadcast %cst_36 : f32 to vector<2x32xf32>
    %97 = arith.mulf %96, %95 : vector<2x32xf32>
    %cst_37 = arith.constant 5.000000e-01 : f32
    %98 = vector.broadcast %cst_37 : f32 to vector<2x32xf32>
    %99 = arith.addf %97, %98 : vector<2x32xf32>
    %100 = vector.extract_strided_slice %83 {offsets = [0, 64], sizes = [2, 32], strides = [1, 1]} : vector<2x128xf32> to vector<2x32xf32>
    %101 = math.tanh %100 : vector<2x32xf32>
    %102 = vector.extract_strided_slice %83 {offsets = [0, 96], sizes = [2, 32], strides = [1, 1]} : vector<2x128xf32> to vector<2x32xf32>
    %cst_38 = arith.constant 5.000000e-01 : f32
    %103 = vector.broadcast %cst_38 : f32 to vector<2x32xf32>
    %104 = arith.mulf %103, %102 : vector<2x32xf32>
    %105 = math.tanh %104 : vector<2x32xf32>
    %cst_39 = arith.constant 5.000000e-01 : f32
    %106 = vector.broadcast %cst_39 : f32 to vector<2x32xf32>
    %107 = arith.mulf %106, %105 : vector<2x32xf32>
    %cst_40 = arith.constant 5.000000e-01 : f32
    %108 = vector.broadcast %cst_40 : f32 to vector<2x32xf32>
    %109 = arith.addf %107, %108 : vector<2x32xf32>
    %110 = arith.mulf %99, %77 : vector<2x32xf32>
    %111 = arith.mulf %91, %101 : vector<2x32xf32>
    %112 = arith.addf %110, %111 : vector<2x32xf32>
    %113 = math.tanh %112 : vector<2x32xf32>
    %114 = arith.mulf %109, %113 : vector<2x32xf32>
    %115 = vector.extract_strided_slice %9 {offsets = [6, 0], sizes = [2, 128], strides = [1, 1]} : vector<16x128xf32> to vector<2x128xf32>
    %c0_41 = arith.constant 0 : index
    %c0_42 = arith.constant 0 : index
    %116 = vector.load %arg2[%c0_41, %c0_42] : memref<32x128xf32, #tpu.memory_space<vmem>>, vector<32x128xf32>
    %cst_43 = arith.constant dense<0.000000e+00> : vector<2x128xf32>
    %117 = tpu.matmul %114, %116, %cst_43 {dimension_numbers = #tpu.dot_dimension_numbers<[1], [0], [0], [1], [0, 0, 1, 1], [], []>} : vector<2x32xf32>, vector<32x128xf32>, vector<2x128xf32> -> vector<2x128xf32>
    %118 = arith.addf %115, %117 : vector<2x128xf32>
    %119 = vector.extract_strided_slice %118 {offsets = [0, 0], sizes = [2, 32], strides = [1, 1]} : vector<2x128xf32> to vector<2x32xf32>
    %cst_44 = arith.constant 5.000000e-01 : f32
    %120 = vector.broadcast %cst_44 : f32 to vector<2x32xf32>
    %121 = arith.mulf %120, %119 : vector<2x32xf32>
    %122 = math.tanh %121 : vector<2x32xf32>
    %cst_45 = arith.constant 5.000000e-01 : f32
    %123 = vector.broadcast %cst_45 : f32 to vector<2x32xf32>
    %124 = arith.mulf %123, %122 : vector<2x32xf32>
    %cst_46 = arith.constant 5.000000e-01 : f32
    %125 = vector.broadcast %cst_46 : f32 to vector<2x32xf32>
    %126 = arith.addf %124, %125 : vector<2x32xf32>
    %127 = vector.extract_strided_slice %118 {offsets = [0, 32], sizes = [2, 32], strides = [1, 1]} : vector<2x128xf32> to vector<2x32xf32>
    %cst_47 = arith.constant 5.000000e-01 : f32
    %128 = vector.broadcast %cst_47 : f32 to vector<2x32xf32>
    %129 = arith.mulf %128, %127 : vector<2x32xf32>
    %130 = math.tanh %129 : vector<2x32xf32>
    %cst_48 = arith.constant 5.000000e-01 : f32
    %131 = vector.broadcast %cst_48 : f32 to vector<2x32xf32>
    %132 = arith.mulf %131, %130 : vector<2x32xf32>
    %cst_49 = arith.constant 5.000000e-01 : f32
    %133 = vector.broadcast %cst_49 : f32 to vector<2x32xf32>
    %134 = arith.addf %132, %133 : vector<2x32xf32>
    %135 = vector.extract_strided_slice %118 {offsets = [0, 64], sizes = [2, 32], strides = [1, 1]} : vector<2x128xf32> to vector<2x32xf32>
    %136 = math.tanh %135 : vector<2x32xf32>
    %137 = vector.extract_strided_slice %118 {offsets = [0, 96], sizes = [2, 32], strides = [1, 1]} : vector<2x128xf32> to vector<2x32xf32>
    %cst_50 = arith.constant 5.000000e-01 : f32
    %138 = vector.broadcast %cst_50 : f32 to vector<2x32xf32>
    %139 = arith.mulf %138, %137 : vector<2x32xf32>
    %140 = math.tanh %139 : vector<2x32xf32>
    %cst_51 = arith.constant 5.000000e-01 : f32
    %141 = vector.broadcast %cst_51 : f32 to vector<2x32xf32>
    %142 = arith.mulf %141, %140 : vector<2x32xf32>
    %cst_52 = arith.constant 5.000000e-01 : f32
    %143 = vector.broadcast %cst_52 : f32 to vector<2x32xf32>
    %144 = arith.addf %142, %143 : vector<2x32xf32>
    %145 = arith.mulf %134, %112 : vector<2x32xf32>
    %146 = arith.mulf %126, %136 : vector<2x32xf32>
    %147 = arith.addf %145, %146 : vector<2x32xf32>
    %148 = math.tanh %147 : vector<2x32xf32>
    %149 = arith.mulf %144, %148 : vector<2x32xf32>
    %150 = vector.extract_strided_slice %9 {offsets = [8, 0], sizes = [2, 128], strides = [1, 1]} : vector<16x128xf32> to vector<2x128xf32>
    %c0_53 = arith.constant 0 : index
    %c0_54 = arith.constant 0 : index
    %151 = vector.load %arg2[%c0_53, %c0_54] : memref<32x128xf32, #tpu.memory_space<vmem>>, vector<32x128xf32>
    %cst_55 = arith.constant dense<0.000000e+00> : vector<2x128xf32>
    %152 = tpu.matmul %149, %151, %cst_55 {dimension_numbers = #tpu.dot_dimension_numbers<[1], [0], [0], [1], [0, 0, 1, 1], [], []>} : vector<2x32xf32>, vector<32x128xf32>, vector<2x128xf32> -> vector<2x128xf32>
    %153 = arith.addf %150, %152 : vector<2x128xf32>
    %154 = vector.extract_strided_slice %153 {offsets = [0, 0], sizes = [2, 32], strides = [1, 1]} : vector<2x128xf32> to vector<2x32xf32>
    %cst_56 = arith.constant 5.000000e-01 : f32
    %155 = vector.broadcast %cst_56 : f32 to vector<2x32xf32>
    %156 = arith.mulf %155, %154 : vector<2x32xf32>
    %157 = math.tanh %156 : vector<2x32xf32>
    %cst_57 = arith.constant 5.000000e-01 : f32
    %158 = vector.broadcast %cst_57 : f32 to vector<2x32xf32>
    %159 = arith.mulf %158, %157 : vector<2x32xf32>
    %cst_58 = arith.constant 5.000000e-01 : f32
    %160 = vector.broadcast %cst_58 : f32 to vector<2x32xf32>
    %161 = arith.addf %159, %160 : vector<2x32xf32>
    %162 = vector.extract_strided_slice %153 {offsets = [0, 32], sizes = [2, 32], strides = [1, 1]} : vector<2x128xf32> to vector<2x32xf32>
    %cst_59 = arith.constant 5.000000e-01 : f32
    %163 = vector.broadcast %cst_59 : f32 to vector<2x32xf32>
    %164 = arith.mulf %163, %162 : vector<2x32xf32>
    %165 = math.tanh %164 : vector<2x32xf32>
    %cst_60 = arith.constant 5.000000e-01 : f32
    %166 = vector.broadcast %cst_60 : f32 to vector<2x32xf32>
    %167 = arith.mulf %166, %165 : vector<2x32xf32>
    %cst_61 = arith.constant 5.000000e-01 : f32
    %168 = vector.broadcast %cst_61 : f32 to vector<2x32xf32>
    %169 = arith.addf %167, %168 : vector<2x32xf32>
    %170 = vector.extract_strided_slice %153 {offsets = [0, 64], sizes = [2, 32], strides = [1, 1]} : vector<2x128xf32> to vector<2x32xf32>
    %171 = math.tanh %170 : vector<2x32xf32>
    %172 = vector.extract_strided_slice %153 {offsets = [0, 96], sizes = [2, 32], strides = [1, 1]} : vector<2x128xf32> to vector<2x32xf32>
    %cst_62 = arith.constant 5.000000e-01 : f32
    %173 = vector.broadcast %cst_62 : f32 to vector<2x32xf32>
    %174 = arith.mulf %173, %172 : vector<2x32xf32>
    %175 = math.tanh %174 : vector<2x32xf32>
    %cst_63 = arith.constant 5.000000e-01 : f32
    %176 = vector.broadcast %cst_63 : f32 to vector<2x32xf32>
    %177 = arith.mulf %176, %175 : vector<2x32xf32>
    %cst_64 = arith.constant 5.000000e-01 : f32
    %178 = vector.broadcast %cst_64 : f32 to vector<2x32xf32>
    %179 = arith.addf %177, %178 : vector<2x32xf32>
    %180 = arith.mulf %169, %147 : vector<2x32xf32>
    %181 = arith.mulf %161, %171 : vector<2x32xf32>
    %182 = arith.addf %180, %181 : vector<2x32xf32>
    %183 = math.tanh %182 : vector<2x32xf32>
    %184 = arith.mulf %179, %183 : vector<2x32xf32>
    %185 = vector.extract_strided_slice %9 {offsets = [10, 0], sizes = [2, 128], strides = [1, 1]} : vector<16x128xf32> to vector<2x128xf32>
    %c0_65 = arith.constant 0 : index
    %c0_66 = arith.constant 0 : index
    %186 = vector.load %arg2[%c0_65, %c0_66] : memref<32x128xf32, #tpu.memory_space<vmem>>, vector<32x128xf32>
    %cst_67 = arith.constant dense<0.000000e+00> : vector<2x128xf32>
    %187 = tpu.matmul %184, %186, %cst_67 {dimension_numbers = #tpu.dot_dimension_numbers<[1], [0], [0], [1], [0, 0, 1, 1], [], []>} : vector<2x32xf32>, vector<32x128xf32>, vector<2x128xf32> -> vector<2x128xf32>
    %188 = arith.addf %185, %187 : vector<2x128xf32>
    %189 = vector.extract_strided_slice %188 {offsets = [0, 0], sizes = [2, 32], strides = [1, 1]} : vector<2x128xf32> to vector<2x32xf32>
    %cst_68 = arith.constant 5.000000e-01 : f32
    %190 = vector.broadcast %cst_68 : f32 to vector<2x32xf32>
    %191 = arith.mulf %190, %189 : vector<2x32xf32>
    %192 = math.tanh %191 : vector<2x32xf32>
    %cst_69 = arith.constant 5.000000e-01 : f32
    %193 = vector.broadcast %cst_69 : f32 to vector<2x32xf32>
    %194 = arith.mulf %193, %192 : vector<2x32xf32>
    %cst_70 = arith.constant 5.000000e-01 : f32
    %195 = vector.broadcast %cst_70 : f32 to vector<2x32xf32>
    %196 = arith.addf %194, %195 : vector<2x32xf32>
    %197 = vector.extract_strided_slice %188 {offsets = [0, 32], sizes = [2, 32], strides = [1, 1]} : vector<2x128xf32> to vector<2x32xf32>
    %cst_71 = arith.constant 5.000000e-01 : f32
    %198 = vector.broadcast %cst_71 : f32 to vector<2x32xf32>
    %199 = arith.mulf %198, %197 : vector<2x32xf32>
    %200 = math.tanh %199 : vector<2x32xf32>
    %cst_72 = arith.constant 5.000000e-01 : f32
    %201 = vector.broadcast %cst_72 : f32 to vector<2x32xf32>
    %202 = arith.mulf %201, %200 : vector<2x32xf32>
    %cst_73 = arith.constant 5.000000e-01 : f32
    %203 = vector.broadcast %cst_73 : f32 to vector<2x32xf32>
    %204 = arith.addf %202, %203 : vector<2x32xf32>
    %205 = vector.extract_strided_slice %188 {offsets = [0, 64], sizes = [2, 32], strides = [1, 1]} : vector<2x128xf32> to vector<2x32xf32>
    %206 = math.tanh %205 : vector<2x32xf32>
    %207 = vector.extract_strided_slice %188 {offsets = [0, 96], sizes = [2, 32], strides = [1, 1]} : vector<2x128xf32> to vector<2x32xf32>
    %cst_74 = arith.constant 5.000000e-01 : f32
    %208 = vector.broadcast %cst_74 : f32 to vector<2x32xf32>
    %209 = arith.mulf %208, %207 : vector<2x32xf32>
    %210 = math.tanh %209 : vector<2x32xf32>
    %cst_75 = arith.constant 5.000000e-01 : f32
    %211 = vector.broadcast %cst_75 : f32 to vector<2x32xf32>
    %212 = arith.mulf %211, %210 : vector<2x32xf32>
    %cst_76 = arith.constant 5.000000e-01 : f32
    %213 = vector.broadcast %cst_76 : f32 to vector<2x32xf32>
    %214 = arith.addf %212, %213 : vector<2x32xf32>
    %215 = arith.mulf %204, %182 : vector<2x32xf32>
    %216 = arith.mulf %196, %206 : vector<2x32xf32>
    %217 = arith.addf %215, %216 : vector<2x32xf32>
    %218 = math.tanh %217 : vector<2x32xf32>
    %219 = arith.mulf %214, %218 : vector<2x32xf32>
    %220 = vector.extract_strided_slice %9 {offsets = [12, 0], sizes = [2, 128], strides = [1, 1]} : vector<16x128xf32> to vector<2x128xf32>
    %c0_77 = arith.constant 0 : index
    %c0_78 = arith.constant 0 : index
    %221 = vector.load %arg2[%c0_77, %c0_78] : memref<32x128xf32, #tpu.memory_space<vmem>>, vector<32x128xf32>
    %cst_79 = arith.constant dense<0.000000e+00> : vector<2x128xf32>
    %222 = tpu.matmul %219, %221, %cst_79 {dimension_numbers = #tpu.dot_dimension_numbers<[1], [0], [0], [1], [0, 0, 1, 1], [], []>} : vector<2x32xf32>, vector<32x128xf32>, vector<2x128xf32> -> vector<2x128xf32>
    %223 = arith.addf %220, %222 : vector<2x128xf32>
    %224 = vector.extract_strided_slice %223 {offsets = [0, 0], sizes = [2, 32], strides = [1, 1]} : vector<2x128xf32> to vector<2x32xf32>
    %cst_80 = arith.constant 5.000000e-01 : f32
    %225 = vector.broadcast %cst_80 : f32 to vector<2x32xf32>
    %226 = arith.mulf %225, %224 : vector<2x32xf32>
    %227 = math.tanh %226 : vector<2x32xf32>
    %cst_81 = arith.constant 5.000000e-01 : f32
    %228 = vector.broadcast %cst_81 : f32 to vector<2x32xf32>
    %229 = arith.mulf %228, %227 : vector<2x32xf32>
    %cst_82 = arith.constant 5.000000e-01 : f32
    %230 = vector.broadcast %cst_82 : f32 to vector<2x32xf32>
    %231 = arith.addf %229, %230 : vector<2x32xf32>
    %232 = vector.extract_strided_slice %223 {offsets = [0, 32], sizes = [2, 32], strides = [1, 1]} : vector<2x128xf32> to vector<2x32xf32>
    %cst_83 = arith.constant 5.000000e-01 : f32
    %233 = vector.broadcast %cst_83 : f32 to vector<2x32xf32>
    %234 = arith.mulf %233, %232 : vector<2x32xf32>
    %235 = math.tanh %234 : vector<2x32xf32>
    %cst_84 = arith.constant 5.000000e-01 : f32
    %236 = vector.broadcast %cst_84 : f32 to vector<2x32xf32>
    %237 = arith.mulf %236, %235 : vector<2x32xf32>
    %cst_85 = arith.constant 5.000000e-01 : f32
    %238 = vector.broadcast %cst_85 : f32 to vector<2x32xf32>
    %239 = arith.addf %237, %238 : vector<2x32xf32>
    %240 = vector.extract_strided_slice %223 {offsets = [0, 64], sizes = [2, 32], strides = [1, 1]} : vector<2x128xf32> to vector<2x32xf32>
    %241 = math.tanh %240 : vector<2x32xf32>
    %242 = vector.extract_strided_slice %223 {offsets = [0, 96], sizes = [2, 32], strides = [1, 1]} : vector<2x128xf32> to vector<2x32xf32>
    %cst_86 = arith.constant 5.000000e-01 : f32
    %243 = vector.broadcast %cst_86 : f32 to vector<2x32xf32>
    %244 = arith.mulf %243, %242 : vector<2x32xf32>
    %245 = math.tanh %244 : vector<2x32xf32>
    %cst_87 = arith.constant 5.000000e-01 : f32
    %246 = vector.broadcast %cst_87 : f32 to vector<2x32xf32>
    %247 = arith.mulf %246, %245 : vector<2x32xf32>
    %cst_88 = arith.constant 5.000000e-01 : f32
    %248 = vector.broadcast %cst_88 : f32 to vector<2x32xf32>
    %249 = arith.addf %247, %248 : vector<2x32xf32>
    %250 = arith.mulf %239, %217 : vector<2x32xf32>
    %251 = arith.mulf %231, %241 : vector<2x32xf32>
    %252 = arith.addf %250, %251 : vector<2x32xf32>
    %253 = math.tanh %252 : vector<2x32xf32>
    %254 = arith.mulf %249, %253 : vector<2x32xf32>
    %255 = vector.extract_strided_slice %9 {offsets = [14, 0], sizes = [2, 128], strides = [1, 1]} : vector<16x128xf32> to vector<2x128xf32>
    %c0_89 = arith.constant 0 : index
    %c0_90 = arith.constant 0 : index
    %256 = vector.load %arg2[%c0_89, %c0_90] : memref<32x128xf32, #tpu.memory_space<vmem>>, vector<32x128xf32>
    %cst_91 = arith.constant dense<0.000000e+00> : vector<2x128xf32>
    %257 = tpu.matmul %254, %256, %cst_91 {dimension_numbers = #tpu.dot_dimension_numbers<[1], [0], [0], [1], [0, 0, 1, 1], [], []>} : vector<2x32xf32>, vector<32x128xf32>, vector<2x128xf32> -> vector<2x128xf32>
    %258 = arith.addf %255, %257 : vector<2x128xf32>
    %259 = vector.extract_strided_slice %258 {offsets = [0, 0], sizes = [2, 32], strides = [1, 1]} : vector<2x128xf32> to vector<2x32xf32>
    %cst_92 = arith.constant 5.000000e-01 : f32
    %260 = vector.broadcast %cst_92 : f32 to vector<2x32xf32>
    %261 = arith.mulf %260, %259 : vector<2x32xf32>
    %262 = math.tanh %261 : vector<2x32xf32>
    %cst_93 = arith.constant 5.000000e-01 : f32
    %263 = vector.broadcast %cst_93 : f32 to vector<2x32xf32>
    %264 = arith.mulf %263, %262 : vector<2x32xf32>
    %cst_94 = arith.constant 5.000000e-01 : f32
    %265 = vector.broadcast %cst_94 : f32 to vector<2x32xf32>
    %266 = arith.addf %264, %265 : vector<2x32xf32>
    %267 = vector.extract_strided_slice %258 {offsets = [0, 32], sizes = [2, 32], strides = [1, 1]} : vector<2x128xf32> to vector<2x32xf32>
    %cst_95 = arith.constant 5.000000e-01 : f32
    %268 = vector.broadcast %cst_95 : f32 to vector<2x32xf32>
    %269 = arith.mulf %268, %267 : vector<2x32xf32>
    %270 = math.tanh %269 : vector<2x32xf32>
    %cst_96 = arith.constant 5.000000e-01 : f32
    %271 = vector.broadcast %cst_96 : f32 to vector<2x32xf32>
    %272 = arith.mulf %271, %270 : vector<2x32xf32>
    %cst_97 = arith.constant 5.000000e-01 : f32
    %273 = vector.broadcast %cst_97 : f32 to vector<2x32xf32>
    %274 = arith.addf %272, %273 : vector<2x32xf32>
    %275 = vector.extract_strided_slice %258 {offsets = [0, 64], sizes = [2, 32], strides = [1, 1]} : vector<2x128xf32> to vector<2x32xf32>
    %276 = math.tanh %275 : vector<2x32xf32>
    %277 = vector.extract_strided_slice %258 {offsets = [0, 96], sizes = [2, 32], strides = [1, 1]} : vector<2x128xf32> to vector<2x32xf32>
    %cst_98 = arith.constant 5.000000e-01 : f32
    %278 = vector.broadcast %cst_98 : f32 to vector<2x32xf32>
    %279 = arith.mulf %278, %277 : vector<2x32xf32>
    %280 = math.tanh %279 : vector<2x32xf32>
    %cst_99 = arith.constant 5.000000e-01 : f32
    %281 = vector.broadcast %cst_99 : f32 to vector<2x32xf32>
    %282 = arith.mulf %281, %280 : vector<2x32xf32>
    %cst_100 = arith.constant 5.000000e-01 : f32
    %283 = vector.broadcast %cst_100 : f32 to vector<2x32xf32>
    %284 = arith.addf %282, %283 : vector<2x32xf32>
    %285 = arith.mulf %274, %252 : vector<2x32xf32>
    %286 = arith.mulf %266, %276 : vector<2x32xf32>
    %287 = arith.addf %285, %286 : vector<2x32xf32>
    %288 = math.tanh %287 : vector<2x32xf32>
    %289 = arith.mulf %284, %288 : vector<2x32xf32>
    %290 = tpu.concatenate %44, %79, %114, %149, %184, %219, %254, %289 in 0 : vector<2x32xf32>, vector<2x32xf32>, vector<2x32xf32>, vector<2x32xf32>, vector<2x32xf32>, vector<2x32xf32>, vector<2x32xf32>, vector<2x32xf32> -> vector<16x32xf32>
    %291 = arith.truncf %290 : vector<16x32xf32> to vector<16x32xbf16>
    %292 = arith.index_cast %6 : i32 to index
    %c0_101 = arith.constant 0 : index
    %293 = vector.load %arg5[%292, %c0_101] : memref<16x32xbf16, #tpu.memory_space<vmem>>, vector<16x32xbf16>
    tpu.vector_store %arg5[%292, %c0_101], %291 {strides = array<i32>} : memref<16x32xbf16, #tpu.memory_space<vmem>>, vector<16x32xbf16>,
    %c1_i32 = arith.constant 1 : i32
    %c0_102 = arith.constant 0 : index
    %c0_103 = arith.constant 0 : index
    %294 = vector.load %arg8[%c0_102, %c0_103] : memref<2x32xf32, #tpu.memory_space<vmem>>, vector<2x32xf32>
    tpu.vector_store %arg8[%c0_102, %c0_103], %289 {strides = array<i32>} : memref<2x32xf32, #tpu.memory_space<vmem>>, vector<2x32xf32>,
    %c0_104 = arith.constant 0 : index
    %c0_105 = arith.constant 0 : index
    %295 = vector.load %arg9[%c0_104, %c0_105] : memref<2x32xf32, #tpu.memory_space<vmem>>, vector<2x32xf32>
    tpu.vector_store %arg9[%c0_104, %c0_105], %287 {strides = array<i32>} : memref<2x32xf32, #tpu.memory_space<vmem>>, vector<2x32xf32>,
    %c0_i32_106 = arith.constant 0 : i32
    %296 = arith.cmpi eq, %arg0, %c0_i32_106 : i32
    %297 = arith.extui %296 : i1 to i32
    %c0_i32_107 = arith.constant 0 : i32
    %298 = arith.cmpi ne, %297, %c0_i32_107 : i32
    scf.if %298 {
      %c0_108 = arith.constant 0 : index
      %c0_109 = arith.constant 0 : index
      %299 = vector.load %arg8[%c0_108, %c0_109] : memref<2x32xf32, #tpu.memory_space<vmem>>, vector<2x32xf32>
      %c0_110 = arith.constant 0 : index
      %c0_111 = arith.constant 0 : index
      %300 = vector.load %arg6[%c0_110, %c0_111] : memref<2x32xf32, #tpu.memory_space<vmem>>, vector<2x32xf32>
      tpu.vector_store %arg6[%c0_110, %c0_111], %299 {strides = array<i32>} : memref<2x32xf32, #tpu.memory_space<vmem>>, vector<2x32xf32>,
      %c0_112 = arith.constant 0 : index
      %c0_113 = arith.constant 0 : index
      %301 = vector.load %arg9[%c0_112, %c0_113] : memref<2x32xf32, #tpu.memory_space<vmem>>, vector<2x32xf32>
      %c0_114 = arith.constant 0 : index
      %c0_115 = arith.constant 0 : index
      %302 = vector.load %arg7[%c0_114, %c0_115] : memref<2x32xf32, #tpu.memory_space<vmem>>, vector<2x32xf32>
      tpu.vector_store %arg7[%c0_114, %c0_115], %301 {strides = array<i32>} : memref<2x32xf32, #tpu.memory_space<vmem>>, vector<2x32xf32>,
    } else {
    }
    return
  }
  func.func @transform_0(%arg0: i32) -> (i32, i32) {
    %c0_i32 = arith.constant 0 : i32
    %c0_i32_0 = arith.constant 0 : i32
    return %arg0, %c0_i32 : i32, i32
  }
  func.func @transform_1(%arg0: i32) -> (i32, i32) {
    %c0_i32 = arith.constant 0 : i32
    %c0_i32_0 = arith.constant 0 : i32
    %c0_i32_1 = arith.constant 0 : i32
    return %c0_i32, %c0_i32_0 : i32, i32
  }
  func.func @transform_2(%arg0: i32) -> (i32, i32) {
    %c0_i32 = arith.constant 0 : i32
    %c0_i32_0 = arith.constant 0 : i32
    %c0_i32_1 = arith.constant 0 : i32
    return %c0_i32, %c0_i32_0 : i32, i32
  }
  func.func @transform_3(%arg0: i32) -> (i32, i32) {
    %c0_i32 = arith.constant 0 : i32
    %c0_i32_0 = arith.constant 0 : i32
    %c0_i32_1 = arith.constant 0 : i32
    return %c0_i32, %c0_i32_0 : i32, i32
  }
  func.func @transform_4(%arg0: i32) -> (i32, i32) {
    %c0_i32 = arith.constant 0 : i32
    %c0_i32_0 = arith.constant 0 : i32
    return %arg0, %c0_i32 : i32, i32
  }
  func.func @transform_5(%arg0: i32) -> (i32, i32) {
    %c0_i32 = arith.constant 0 : i32
    %c0_i32_0 = arith.constant 0 : i32
    %c0_i32_1 = arith.constant 0 : i32
    return %c0_i32, %c0_i32_0 : i32, i32
  }
  func.func @transform_6(%arg0: i32) -> (i32, i32) {
    %c0_i32 = arith.constant 0 : i32
    %c0_i32_0 = arith.constant 0 : i32
    %c0_i32_1 = arith.constant 0 : i32
    return %c0_i32, %c0_i32_0 : i32, i32
  }
}

</mosaic_0001>

<bundles_post_ra>
// kernel: tpu_custom_call.1
= control target key start
LH: loop header
LB: loop body
LE: loop exit
PB: predicated region body
PF: predicated region fallthrough
CT: control target
= control target key end

     0   :  { %12 = vsyncpa [#allocation5], 0  ;;  %s982_s0 = inlined_call_operand.hbm [shape: bf16[16,128], index: 0, kind: input, shape index: {}]   ;;  %s983_s1 = inlined_call_operand.hbm [shape: f32[32,128], index: 1, kind: input, shape index: {}]   ;;  %s984_s2 = inlined_call_operand.hbm [shape: f32[2,32], index: 2, kind: input, shape index: {}]   ;;  %s985_s3 = inlined_call_operand.vmem [shape: f32[2,32], index: 3, kind: input, shape index: {}]   ;;  %s986_s4 = inlined_call_operand.hbm [shape: bf16[16,32], index: 4, kind: output, shape index: {0}]   ;;  %s987_s5 = inlined_call_operand.hbm [shape: f32[2,32], index: 5, kind: output, shape index: {1}]   ;;  %s988_s6 = inlined_call_operand.hbm [shape: f32[2,32], index: 6, kind: output, shape index: {2}]  }
   0x1   :  { %13 = vsyncpa [#allocation8], 0 }
   0x2   :  { %14 = vsyncpa [#allocation6], 0  ;;  %s33_s23 = sshll.u32 %s983_s1, 4  ;;  %s34_s23 = int_to_ptr.hbm [resolvable:$true] %s33_s23 }
   0x3   :  { %15 = vsyncpa [#allocation12], 0  ;;  %s833_s24 = smov [#allocation7]   ;;  %s20_s28 = sshll.u32 %s982_s0, 4  ;;  %s21_s28 = int_to_ptr.hbm [resolvable:$true] %s20_s28 }
   0x4   :  { %s35_s25 = sshll.u32 %s833_s24, 4  ;;  %s834_s29 = smov 128   ;;  %s36_s25 = int_to_ptr.vmem [resolvable:$true] %s35_s25 }
   0x5   :  { %s835_s30 = smov 8   ;;  %s836_s7 = smov [#allocation4]  }
   0x6   :  { %41 = dma.hbm_to_vmem [thread:$0]  %s34_s23, 512, %s36_s25, [#allocation8], %s834_s29, %s834_s29, %s835_s30  }
   0x7   :  { %s22_s8 = sshll.u32 %s836_s7, 4  ;;  %s837_s9 = smov 64   ;;  %s23_s8 = int_to_ptr.vmem [resolvable:$true] %s22_s8 }
   0x8   :  { %s838_s10 = smov 4   ;;  %s47_s12 = sshll.u32 %s984_s2, 4  ;;  %s48_s12 = int_to_ptr.hbm [resolvable:$true] %s47_s12 }
   0x9   :  { %28 = dma.hbm_to_vmem [thread:$0]  %s21_s28, 128, %s23_s8, [#allocation5], %s837_s9, %s837_s9, %s838_s10  }
   0xa   :  { %s839_s13 = smov [#allocation9]  }
   0xb   :  { %s49_s0 = sshll.u32 %s839_s13, 4  ;;  %s50_s0 = int_to_ptr.vmem [resolvable:$true] %s49_s0 }
   0xc   :  { %52 = dma.hbm_to_vmem [thread:$0]  %s48_s12, 32, %s50_s0, [#allocation8]  }
   0xd   :  { %825 = dma.done.wait [#allocation5], 128  }
   0xe   :  { %826 = vsyncadd [#allocation5], 4294967168 }
   0xf   :  { %827 = dma.done.wait [#allocation8], 544  }
  0x10   :  { %828 = vsyncadd [#allocation8], 4294966752  ;;  %vm72_vm0 = vcmask 254976   ;;  %v85_v0 = vld [vmem:[#allocation7 + $0x18] sm:$0xff]  ;;  %v84_v1 = vld [vmem:[#allocation7 + $0x10] sm:$0xff]  ;;  %vm86_vm1 = vcmask 261120  }
  0x11   :  { %102 = vmatpush.msra.mxu0 %v85_v0  ;;  %v71_v2 = vld [vmem:[#allocation9] sm:$0x3]  ;;  %154 = vmatpush.msra.mxu1 %v85_v0  ;;  %v83_v3 = vld [vmem:[#allocation7 + $0x8] sm:$0xff]  ;;  %v74_v6 = vld [vmem:[%s985_s3] sm:$0x3]  ;;  %s840_s15 = smov 32  }
  0x12   :  { %73 = vst.msk [vmem:[#allocation2] sm:$0x3] %vm72_vm0, %v71_v2  ;;  %209 = vmatpush.msra.mxu2 %v85_v0  ;;  %264 = vmatpush.msra.mxu3 %v85_v0  ;;  %v82_v4 = vld [vmem:[#allocation7] sm:$0xff]  ;;  %v898_v7 = vld [vmem:[#allocation4] sm:$0xff]   ;;  %vm517_vm2 = vcmask 1041408   ;;  %vm519_vm3 = vcmask 1043456  }
  0x13   :  { %103 = vmatpush.msra.mxu0 %v84_v1  ;;  %155 = vmatpush.msra.mxu1 %v84_v1  ;;  %75 = vst.msk [vmem:[#allocation3] sm:$0x3] %vm72_vm0, %v74_v6  ;;  %v901_v8 = vunpack.c.l.bf16 %v898_v7  ;;  %vm521_vm4 = vcmask 1045504   ;;  %s841_s3 = smov 96   ;;  %vm543_vm5 = vcmask 261126   ;;  %vm536_vm6 = vcmask 257024  }
  0x14   :  { %210 = vmatpush.msra.mxu2 %v84_v1  ;;  %265 = vmatpush.msra.mxu3 %v84_v1  ;;  %s842_s16 = smov [#allocation10]   ;;  %s564_s20 = sshll.u32 %s986_s4, 4  ;;  %s565_s20 = int_to_ptr.hbm [resolvable:$true] %s564_s20 }
  0x15   :  { %104 = vmatpush.msra.mxu0 %v83_v3  ;;  %156 = vmatpush.msra.mxu1 %v83_v3  ;;  %s562_s17 = sshll.u32 %s842_s16, 4  ;;  %s843_s21 = smov [#allocation11]   ;;  %s563_s17 = int_to_ptr.vmem [resolvable:$true] %s562_s17 }
  0x16   :  { %211 = vmatpush.msra.mxu2 %v83_v3  ;;  %266 = vmatpush.msra.mxu3 %v83_v3  ;;  %s576_s22 = sshll.u32 %s843_s21, 4  ;;  %s578_s25 = sshll.u32 %s987_s5, 4  ;;  %s577_s22 = int_to_ptr.vmem [resolvable:$true] %s576_s22  ;;  %s579_s25 = int_to_ptr.hbm [resolvable:$true] %s578_s25 }
  0x17   :  { %105 = vmatpush.msra.mxu0 %v82_v4  ;;  %157 = vmatpush.msra.mxu1 %v82_v4  ;;  %s844_s26 = smov [#allocation13]   ;;  %s589_s30 = sshll.u32 %s988_s6, 4  ;;  %s590_s30 = int_to_ptr.hbm [resolvable:$true] %s589_s30 }
  0x18   :  { %212 = vmatpush.msra.mxu2 %v82_v4  ;;  %267 = vmatpush.msra.mxu3 %v82_v4  ;;  %s587_s27 = sshll.u32 %s844_s26, 4  ;;  %s588_s27 = int_to_ptr.vmem [resolvable:$true] %s587_s27 }
  0x19   :  { %v76_v5 = vld [vmem:[#allocation2] sm:$0x3]  ;;  %319 = vmatpush.msrb.mxu0 %v85_v0  ;;  %370 = vmatpush.msrb.mxu1 %v85_v0 }
  0x1a   :  { %609 = vmatmul.msk.f32.vlgmr.msra.gmra.mxu0 %vm86_vm1, %v76_v5  ;;  %425 = vmatpush.msrb.mxu2 %v85_v0  ;;  %v77_v12 = vld [vmem:[#allocation3] sm:$0x3] }
  0x1b   :  { %320 = vmatpush.msrb.mxu0 %v84_v1  ;;  %371 = vmatpush.msrb.mxu1 %v84_v1 }
  0x1c   :  { %426 = vmatpush.msrb.mxu2 %v84_v1  ;;  %480 = vmatpush.msrb.mxu3 %v85_v0 }
  0x1d   :  { %321 = vmatpush.msrb.mxu0 %v83_v3  ;;  %372 = vmatpush.msrb.mxu1 %v83_v3 }
  0x1e   :  { %427 = vmatpush.msrb.mxu2 %v83_v3  ;;  %481 = vmatpush.msrb.mxu3 %v84_v1 }
  0x1f   :  { %322 = vmatpush.msrb.mxu0 %v82_v4  ;;  %373 = vmatpush.msrb.mxu1 %v82_v4 }
  0x20   :  { %428 = vmatpush.msrb.mxu2 %v82_v4  ;;  %482 = vmatpush.msrb.mxu3 %v83_v3 }
  0x22   :  { %483 = vmatpush.msrb.mxu3 %v82_v4 }
  0x97   :  { %v107_v9 = vpop.f32.mrf.mxu0 }
  0x98   :  { %v110_v10 = vadd.f32 %v901_v8, %v107_v9 }
  0x9a   :  { %633 = vtanh.f32 %v110_v10  ;;  %v111_v13 = vmul.f32 0.5, %v110_v10 }
  0x9c   :  { %635 = vtanh.f32 %v111_v13 }
  0xa0   :  { %v634_v11 = vpop.eup %633 }
  0xa1   :  { %122 = vrot.lane.b32.xlu0 %v634_v11, %s837_s9 }
  0xa2   :  { %v636_v14 = vpop.eup %635 }
  0xa3   :  { %v113_v15 = vmul.f32 0.5, %v636_v14 }
  0xa5   :  { %v114_v16 = vadd.f32 0.5, %v113_v15 }
  0xa9   :  { %117 = vrot.lane.b32.xlu0 %v77_v12, %s840_s15 }
 0x113   :  { %v123_v17 = vpop.permute.xlu0 %122 }
 0x114   :  { %v125_v18 = vmul.f32 %v123_v17, %v114_v16 }
 0x116   :  { %127 = vrot.lane.b32.xlu1 %v125_v18, %s840_s15 }
 0x11b   :  { %v118_v19 = vpop.permute.xlu0 %117 }
 0x11c   :  { %v120_v20 = vmul.f32 %v118_v19, %v114_v16 }
 0x188   :  { %v128_v21 = vpop.permute.xlu1 %127 }
 0x189   :  { %v130_v22 = vadd.f32 %v128_v21, %v120_v20 }
 0x18b   :  { %637 = vtanh.f32 %v130_v22  ;;  %v172_v37 = vrot.slane %v130_v22, 6 }
 0x191   :  { %v638_v23 = vpop.eup %637 }
 0x192   :  { %133 = vrot.lane.b32.xlu1 %v638_v23, %s837_s9 }
 0x204   :  { %v134_v24 = vpop.permute.xlu1 %133 }
 0x205   :  { %v136_v25 = vmul.f32 %v134_v24, %v114_v16  ;;  %v934_v24 = vunpack.c.h.bf16 %v898_v7 }
 0x207   :  { %138 = vrot.lane.b32.xlu2 %v136_v25, %s840_s15 }
 0x261   :  { %v139_v26 = vpop.permute.xlu2 %138 }
 0x262   :  { %610 = vmatmul.msk.f32.vlgmr.msra.gmra.mxu1 %vm86_vm1, %v139_v26 }
 0x2df   :  { %v159_v27 = vpop.f32.mrf.mxu1 }
 0x2e0   :  { %v163_v28 = vrot.slane %v159_v27, 6 }
 0x2e2   :  { %v165_v29 = vadd.f32 %v901_v8, %v163_v28 }
 0x2e4   :  { %639 = vtanh.f32 %v165_v29  ;;  %v166_v31 = vmul.f32 0.5, %v165_v29 }
 0x2e6   :  { %641 = vtanh.f32 %v166_v31 }
 0x2ea   :  { %v640_v30 = vpop.eup %639 }
 0x2eb   :  { %176 = vrot.lane.b32.xlu2 %v640_v30, %s837_s9 }
 0x2ec   :  { %v642_v32 = vpop.eup %641 }
 0x2ed   :  { %v168_v33 = vmul.f32 0.5, %v642_v32 }
 0x2ef   :  { %v169_v34 = vadd.f32 0.5, %v168_v33 }
 0x2f1   :  { %v174_v38 = vmul.f32 %v172_v37, %v169_v34 }
 0x345   :  { %v177_v35 = vpop.permute.xlu2 %176 }
 0x346   :  { %v179_v36 = vmul.f32 %v177_v35, %v169_v34 }
 0x348   :  { %181 = vrot.lane.b32.xlu0 %v179_v36, %s840_s15 }
 0x3ba   :  { %v182_v39 = vpop.permute.xlu0 %181 }
 0x3bb   :  { %v184_v40 = vadd.f32 %v182_v39, %v174_v38 }
 0x3bd   :  { %643 = vtanh.f32 %v184_v40  ;;  %v227_v56 = vrot.slane %v184_v40, 6 }
 0x3c3   :  { %v644_v41 = vpop.eup %643 }
 0x3c4   :  { %187 = vrot.lane.b32.xlu1 %v644_v41, %s837_s9 }
 0x436   :  { %v188_v42 = vpop.permute.xlu1 %187 }
 0x437   :  { %v190_v43 = vmul.f32 %v188_v42, %v169_v34 }
 0x439   :  { %v192_v44 = vrot.slane %v190_v43, 2  ;;  %v518_v63 = vsel %vm517_vm2, %v136_v25, %v190_v43 }
 0x43b   :  { %193 = vrot.lane.b32.xlu2 %v192_v44, %s840_s15 }
 0x495   :  { %v194_v45 = vpop.permute.xlu2 %193 }
 0x496   :  { %611 = vmatmul.msk.f32.vlgmr.msra.gmra.mxu2 %vm86_vm1, %v194_v45 }
 0x519   :  { %v214_v46 = vpop.f32.mrf.mxu2 }
 0x51a   :  { %v218_v47 = vrot.slane %v214_v46, 4 }
 0x51c   :  { %v220_v48 = vadd.f32 %v901_v8, %v218_v47 }
 0x51e   :  { %645 = vtanh.f32 %v220_v48  ;;  %v221_v50 = vmul.f32 0.5, %v220_v48 }
 0x520   :  { %647 = vtanh.f32 %v221_v50 }
 0x524   :  { %v646_v49 = vpop.eup %645 }
 0x525   :  { %231 = vrot.lane.b32.xlu0 %v646_v49, %s837_s9 }
 0x526   :  { %v648_v51 = vpop.eup %647 }
 0x527   :  { %v223_v52 = vmul.f32 0.5, %v648_v51 }
 0x529   :  { %v224_v53 = vadd.f32 0.5, %v223_v52 }
 0x52b   :  { %v229_v57 = vmul.f32 %v227_v56, %v224_v53 }
 0x597   :  { %v232_v54 = vpop.permute.xlu0 %231 }
 0x598   :  { %v234_v55 = vmul.f32 %v232_v54, %v224_v53 }
 0x59a   :  { %236 = vrot.lane.b32.xlu1 %v234_v55, %s840_s15 }
 0x60c   :  { %v237_v58 = vpop.permute.xlu1 %236 }
 0x60d   :  { %v239_v59 = vadd.f32 %v237_v58, %v229_v57 }
 0x60f   :  { %649 = vtanh.f32 %v239_v59  ;;  %v282_v15 = vrot.slane %v239_v59, 6 }
 0x615   :  { %v650_v60 = vpop.eup %649 }
 0x616   :  { %242 = vrot.lane.b32.xlu2 %v650_v60, %s837_s9 }
 0x670   :  { %v243_v61 = vpop.permute.xlu2 %242 }
 0x671   :  { %v245_v62 = vmul.f32 %v243_v61, %v224_v53 }
 0x673   :  { %v247_v0 = vrot.slane %v245_v62, 4  ;;  %v520_v1 = vsel %vm519_vm3, %v518_v63, %v245_v62 }
 0x675   :  { %248 = vrot.lane.b32.xlu0 %v247_v0, %s840_s15 }
 0x6e7   :  { %v249_v2 = vpop.permute.xlu0 %248 }
 0x6e8   :  { %612 = vmatmul.msk.f32.vlgmr.msra.gmra.mxu3 %vm86_vm1, %v249_v2 }
 0x76b   :  { %v269_v3 = vpop.f32.mrf.mxu3 }
 0x76c   :  { %v273_v4 = vrot.slane %v269_v3, 2 }
 0x76e   :  { %v275_v5 = vadd.f32 %v901_v8, %v273_v4 }
 0x770   :  { %651 = vtanh.f32 %v275_v5  ;;  %v276_v9 = vmul.f32 0.5, %v275_v5 }
 0x772   :  { %653 = vtanh.f32 %v276_v9 }
 0x776   :  { %v652_v6 = vpop.eup %651 }
 0x777   :  { %286 = vrot.lane.b32.xlu1 %v652_v6, %s837_s9 }
 0x778   :  { %v654_v10 = vpop.eup %653 }
 0x779   :  { %v278_v11 = vmul.f32 0.5, %v654_v10 }
 0x77b   :  { %v279_v12 = vadd.f32 0.5, %v278_v11 }
 0x77d   :  { %v284_v16 = vmul.f32 %v282_v15, %v279_v12 }
 0x7e9   :  { %v287_v13 = vpop.permute.xlu1 %286 }
 0x7ea   :  { %v289_v14 = vmul.f32 %v287_v13, %v279_v12 }
 0x7ec   :  { %291 = vrot.lane.b32.xlu2 %v289_v14, %s840_s15 }
 0x846   :  { %v292_v17 = vpop.permute.xlu2 %291 }
 0x847   :  { %v294_v18 = vadd.f32 %v292_v17, %v284_v16 }
 0x849   :  { %655 = vtanh.f32 %v294_v18  ;;  %v334_v34 = vrot.slane %v294_v18, 6 }
 0x84f   :  { %v656_v19 = vpop.eup %655 }
 0x850   :  { %297 = vrot.lane.b32.xlu0 %v656_v19, %s837_s9 }
 0x8c2   :  { %v298_v8 = vpop.permute.xlu0 %297 }
 0x8c3   :  { %v300_v20 = vmul.f32 %v298_v8, %v279_v12 }
 0x8c5   :  { %v302_v21 = vrot.slane %v300_v20, 6  ;;  %v929_v22 = vsel %vm521_vm4, %v520_v1, %v300_v20 }
 0x8c7   :  { %303 = vrot.lane.b32.xlu1 %v302_v21, %s840_s15 }
 0x939   :  { %v304_v23 = vpop.permute.xlu1 %303 }
 0x93a   :  { %613 = vmatmul.msk.f32.vlgmr.msrb.gmra.mxu0 %vm86_vm1, %v304_v23 }
 0x9b7   :  { %v324_v25 = vpop.f32.mrf.mxu0 }
 0x9b8   :  { %v327_v26 = vadd.f32 %v934_v24, %v324_v25 }
 0x9ba   :  { %657 = vtanh.f32 %v327_v26  ;;  %v328_v28 = vmul.f32 0.5, %v327_v26 }
 0x9bc   :  { %659 = vtanh.f32 %v328_v28 }
 0x9c0   :  { %v658_v27 = vpop.eup %657 }
 0x9c1   :  { %338 = vrot.lane.b32.xlu2 %v658_v27, %s837_s9 }
 0x9c2   :  { %v660_v29 = vpop.eup %659 }
 0x9c3   :  { %v330_v30 = vmul.f32 0.5, %v660_v29 }
 0x9c5   :  { %v331_v31 = vadd.f32 0.5, %v330_v30 }
 0x9c7   :  { %v336_v35 = vmul.f32 %v334_v34, %v331_v31  ;;  %v526_v34 = vpack.c.bf16 %v929_v22, %v929_v22 }
 0xa1b   :  { %v339_v32 = vpop.permute.xlu2 %338 }
 0xa1c   :  { %v341_v33 = vmul.f32 %v339_v32, %v331_v31 }
 0xa1e   :  { %343 = vrot.lane.b32.xlu0 %v341_v33, %s840_s15 }
 0xa90   :  { %v344_v7 = vpop.permute.xlu0 %343 }
 0xa91   :  { %v346_v36 = vadd.f32 %v344_v7, %v336_v35 }
 0xa93   :  { %661 = vtanh.f32 %v346_v36  ;;  %v388_v51 = vrot.slane %v346_v36, 6 }
 0xa99   :  { %v662_v37 = vpop.eup %661 }
 0xa9a   :  { %349 = vrot.lane.b32.xlu1 %v662_v37, %s837_s9 }
 0xb0c   :  { %v350_v38 = vpop.permute.xlu1 %349 }
 0xb0d   :  { %v352_v39 = vmul.f32 %v350_v38, %v331_v31 }
 0xb0f   :  { %354 = vrot.lane.b32.xlu2 %v352_v39, %s840_s15 }
 0xb69   :  { %v355_v40 = vpop.permute.xlu2 %354 }
 0xb6a   :  { %614 = vmatmul.msk.f32.vlgmr.msrb.gmra.mxu1 %vm86_vm1, %v355_v40 }
 0xbe7   :  { %v375_v41 = vpop.f32.mrf.mxu1 }
 0xbe8   :  { %v379_v42 = vrot.slane %v375_v41, 6 }
 0xbea   :  { %v381_v43 = vadd.f32 %v934_v24, %v379_v42 }
 0xbec   :  { %663 = vtanh.f32 %v381_v43  ;;  %v382_v45 = vmul.f32 0.5, %v381_v43 }
 0xbee   :  { %665 = vtanh.f32 %v382_v45 }
 0xbf2   :  { %v664_v44 = vpop.eup %663 }
 0xbf3   :  { %392 = vrot.lane.b32.xlu0 %v664_v44, %s837_s9 }
 0xbf4   :  { %v666_v46 = vpop.eup %665 }
 0xbf5   :  { %v384_v47 = vmul.f32 0.5, %v666_v46 }
 0xbf7   :  { %v385_v48 = vadd.f32 0.5, %v384_v47 }
 0xbf9   :  { %v390_v52 = vmul.f32 %v388_v51, %v385_v48 }
 0xc65   :  { %v393_v49 = vpop.permute.xlu0 %392 }
 0xc66   :  { %v395_v50 = vmul.f32 %v393_v49, %v385_v48 }
 0xc68   :  { %397 = vrot.lane.b32.xlu1 %v395_v50, %s840_s15 }
 0xcda   :  { %v398_v53 = vpop.permute.xlu1 %397 }
 0xcdb   :  { %v400_v54 = vadd.f32 %v398_v53, %v390_v52 }
 0xcdd   :  { %667 = vtanh.f32 %v400_v54  ;;  %v443_v6 = vrot.slane %v400_v54, 6 }
 0xce3   :  { %v668_v55 = vpop.eup %667 }
 0xce4   :  { %403 = vrot.lane.b32.xlu2 %v668_v55, %s837_s9 }
 0xd3e   :  { %v404_v56 = vpop.permute.xlu2 %403 }
 0xd3f   :  { %v406_v57 = vmul.f32 %v404_v56, %v385_v48 }
 0xd41   :  { %v408_v58 = vrot.slane %v406_v57, 2  ;;  %v523_v15 = vsel %vm517_vm2, %v352_v39, %v406_v57 }
 0xd43   :  { %409 = vrot.lane.b32.xlu0 %v408_v58, %s840_s15 }
 0xdb5   :  { %v410_v59 = vpop.permute.xlu0 %409 }
 0xdb6   :  { %615 = vmatmul.msk.f32.vlgmr.msrb.gmra.mxu2 %vm86_vm1, %v410_v59 }
 0xe39   :  { %v430_v60 = vpop.f32.mrf.mxu2 }
 0xe3a   :  { %v434_v61 = vrot.slane %v430_v60, 4 }
 0xe3c   :  { %v436_v62 = vadd.f32 %v934_v24, %v434_v61 }
 0xe3e   :  { %669 = vtanh.f32 %v436_v62  ;;  %v437_v0 = vmul.f32 0.5, %v436_v62 }
 0xe40   :  { %671 = vtanh.f32 %v437_v0 }
 0xe44   :  { %v670_v63 = vpop.eup %669 }
 0xe45   :  { %447 = vrot.lane.b32.xlu1 %v670_v63, %s837_s9 }
 0xe46   :  { %v672_v1 = vpop.eup %671 }
 0xe47   :  { %v439_v2 = vmul.f32 0.5, %v672_v1 }
 0xe49   :  { %v440_v3 = vadd.f32 0.5, %v439_v2 }
 0xe4b   :  { %v445_v9 = vmul.f32 %v443_v6, %v440_v3 }
 0xeb7   :  { %v448_v4 = vpop.permute.xlu1 %447 }
 0xeb8   :  { %v450_v5 = vmul.f32 %v448_v4, %v440_v3 }
 0xeba   :  { %452 = vrot.lane.b32.xlu2 %v450_v5, %s840_s15 }
 0xf14   :  { %v453_v10 = vpop.permute.xlu2 %452 }
 0xf15   :  { %v455_v11 = vadd.f32 %v453_v10, %v445_v9 }
 0xf17   :  { %673 = vtanh.f32 %v455_v11  ;;  %v498_v30 = vrot.slane %v455_v11, 6 }
 0xf1d   :  { %v674_v12 = vpop.eup %673 }
 0xf1e   :  { %458 = vrot.lane.b32.xlu0 %v674_v12, %s837_s9 }
 0xf90   :  { %v459_v13 = vpop.permute.xlu0 %458 }
 0xf91   :  { %v461_v14 = vmul.f32 %v459_v13, %v440_v3 }
 0xf93   :  { %v463_v16 = vrot.slane %v461_v14, 4  ;;  %v524_v17 = vsel %vm519_vm3, %v523_v15, %v461_v14 }
 0xf95   :  { %464 = vrot.lane.b32.xlu1 %v463_v16, %s840_s15 }
0x1007   :  { %v465_v18 = vpop.permute.xlu1 %464 }
0x1008   :  { %616 = vmatmul.msk.f32.vlgmr.msrb.gmra.mxu3 %vm86_vm1, %v465_v18 }
0x108b   :  { %v485_v19 = vpop.f32.mrf.mxu3 }
0x108c   :  { %v489_v8 = vrot.slane %v485_v19, 2 }
0x108e   :  { %v491_v20 = vadd.f32 %v934_v24, %v489_v8 }
0x1090   :  { %675 = vtanh.f32 %v491_v20  ;;  %v492_v23 = vmul.f32 0.5, %v491_v20 }
0x1092   :  { %677 = vtanh.f32 %v492_v23 }
0x1096   :  { %v676_v21 = vpop.eup %675 }
0x1097   :  { %502 = vrot.lane.b32.xlu2 %v676_v21, %s837_s9 }
0x1098   :  { %v678_v25 = vpop.eup %677 }
0x1099   :  { %v494_v26 = vmul.f32 0.5, %v678_v25 }
0x109b   :  { %v495_v27 = vadd.f32 0.5, %v494_v26 }
0x109d   :  { %v500_v31 = vmul.f32 %v498_v30, %v495_v27 }
0x10f1   :  { %v503_v28 = vpop.permute.xlu2 %502 }
0x10f2   :  { %v505_v29 = vmul.f32 %v503_v28, %v495_v27 }
0x10f4   :  { %507 = vrot.lane.b32.xlu0 %v505_v29, %s840_s15 }
0x1166   :  { %v508_v32 = vpop.permute.xlu0 %507 }
0x1167   :  { %v510_v33 = vadd.f32 %v508_v32, %v500_v31 }
0x1169   :  { %679 = vtanh.f32 %v510_v33  ;;  %546 = vrot.lane.b32.xlu0 %v510_v33, %s841_s3 }
0x116f   :  { %v680_v24 = vpop.eup %679 }
0x1170   :  { %513 = vrot.lane.b32.xlu1 %v680_v24, %s837_s9 }
0x1178   :  { %530 = vrot.lane.b32.xlu1 %v526_v34, %s840_s15 }
0x11db   :  { %v547_v35 = vpop.permute.xlu0 %546 }
0x11dc   :  { %549 = vst.msk [vmem:[#allocation3 - $0x6] sm:$0xc0] %vm543_vm5, %v547_v35 }
0x11e2   :  { %v514_v7 = vpop.permute.xlu1 %513 }
0x11e3   :  { %v516_v36 = vmul.f32 %v514_v7, %v495_v27  ;;  %v556_v37 = vld [vmem:[#allocation3] sm:$0x3] }
0x11e4   :  { %557 = vst.msk [vmem:[#allocation13] sm:$0x3] %vm72_vm0, %v556_v37 }
0x11e5   :  { %540 = vrot.lane.b32.xlu2 %v516_v36, %s840_s15  ;;  %v525_v38 = vsel %vm521_vm4, %v524_v17, %v516_v36 }
0x11e6   :  { %v527_v40 = vpack.c.bf16 %v525_v38, %v525_v38 }
0x11ea   :  { %v531_v39 = vpop.permute.xlu1 %530 }
0x11eb   :  { %537 = vst.msk [vmem:[#allocation10] sm:$0xf] %vm536_vm6, %v531_v39 }
0x11ed   :  { %532 = vrot.lane.b32.xlu2 %v527_v40, %s840_s15 }
0x123f   :  { %v541_v22 = vpop.permute.xlu2 %540 }
0x1240   :  { %544 = vst.msk [vmem:[#allocation2 - $0x6] sm:$0xc0] %vm543_vm5, %v541_v22 }
0x1247   :  { %v533_v41 = vpop.permute.xlu2 %532  ;;  %v553_v42 = vld [vmem:[#allocation2] sm:$0x3] }
0x1248   :  { %538 = vst.msk [vmem:[#allocation10 + $0x4] sm:$0xf] %vm536_vm6, %v533_v41 }
0x1249   :  { %555 = vst.msk [vmem:[#allocation11] sm:$0x3] %vm72_vm0, %v553_v42  ;;  %570 = dma.vmem_to_hbm [thread:$0]  %s563_s17, 128, %s565_s20, [#allocation6], %s837_s9, %s837_s9, %s838_s10  }
0x124a   :  { %581 = dma.vmem_to_hbm [thread:$0]  %s577_s22, 32, %s579_s25, [#allocation12]  }
0x124b   :  { %592 = dma.vmem_to_hbm [thread:$0]  %s588_s27, 32, %s590_s30, [#allocation12]  }
0x124c   :  { %829 = dma.done.wait [#allocation6], 128  }
0x124d   :  { %830 = vsyncadd [#allocation6], 4294967168 }
0x124e   :  { %831 = dma.done.wait [#allocation12], 64  }
0x124f   :  { %832 = vsyncadd [#allocation12], 4294967232 }
0x1250   :  { %605 = vsyncpa [#allocation5], 1 }
0x1251   :  { %606 = vsyncpa [#allocation8], 1 }
0x1252   :  { %607 = vsyncpa [#allocation6], 1 }
0x1253   :  { %608 = vsyncpa [#allocation12], 1 }

</bundles_post_ra>
